<compile_context>
chip_gen: v5e
topology: v5e:2x2
jax: 0.10.0
libtpu: 0.0.40
codegen_flags: <defaults>
</compile_context>

<pallas_src>
import functools

import jax
import jax.numpy as jnp
from jax import lax
from jax.experimental import pallas as pl
from jax.experimental.pallas import tpu as pltpu


# ----------------------------------------------------------------------------
# Pallas kernel: one batch-group per grid step, everything in (C, Bt*H*W).
# ----------------------------------------------------------------------------
def _dslstm_kernel(x_ref, h_ref, c_ref, mask_ref, wh_ref, bh_ref, wg_ref, bg_ref,
                   out_ref, *, width, mxu_dtype):
    lanes = x_ref.shape[-1]
    hid = c_ref.shape[1]

    x_in = x_ref[0]            # (cxp, lanes)    x channels (zero-padded to cxp)
    h_in = h_ref[0]            # (3*hid, lanes)  three prev hidden states stacked
    c_prev = c_ref[0]          # (hid, lanes)
    masks = mask_ref[...]      # (8, lanes) f32 {0,1}, per off-center tap

    def im2col(arr):
        """(C, lanes) -> (9*C, lanes) in mxu_dtype.

        Masked flat rolls reproduce a zero-padded 3x3 'same' conv; the mask is
        built from the within-image position so wrap across image boundaries in
        the folded lane axis is zeroed too.
        """
        chunks = []
        for t in range(9):
            oy, ox = t // 3 - 1, t % 3 - 1
            s = oy * width + ox
            if s == 0:
                r = arr
            else:
                mrow = t if t < 4 else t - 1
                r = pltpu.roll(arr, shift=(-s) % lanes, axis=1) * masks[mrow:mrow + 1]
            chunks.append(r.astype(mxu_dtype))
        return jnp.concatenate(chunks, axis=0)

    # h_i = relu(conv3x3(prev_hidden_i) + b_i): one fused block-diagonal matmul.
    hs = jnp.maximum(
        jnp.dot(wh_ref[...], im2col(h_in), preferred_element_type=jnp.float32)
        + bh_ref[...], 0.0)                                         # (3, lanes) f32

    # gates = conv3x3(concat(x, h1, h2, h3)) + b: one matmul.
    gates = jnp.dot(wg_ref[...], im2col(jnp.concatenate([x_in, hs], axis=0)),
                    preferred_element_type=jnp.float32) + bg_ref[...]  # (4*hid, lanes)

    def sigmoid(v):            # EUP tanh instead of exp + divide
        return 0.5 * (1.0 + jnp.tanh(0.5 * v))

    # chunk(4, dim=channel) order: in, remember, out, cell (8-row aligned slices).
    in_g = sigmoid(gates[0 * hid:1 * hid])
    rem_g = sigmoid(gates[1 * hid:2 * hid])
    out_g = sigmoid(gates[2 * hid:3 * hid])
    cel_g = jnp.tanh(gates[3 * hid:4 * hid])

    cell = rem_g * c_prev + in_g * cel_g
    hidden = out_g * jnp.tanh(cell)
    # One fused lane-dense store: rows [0:hid] = cell, rows [hid:2*hid] = hidden.
    out_ref[0] = jnp.concatenate([cell, hidden], axis=0)


# ----------------------------------------------------------------------------
# Weight packing: two lane-dense weight slabs (K multiples of 8) + f32 biases.
# ----------------------------------------------------------------------------
def _pack_weights(params, c_in, hid, mxu_dtype):
    cp = ((c_in + 3 + 7) // 8) * 8     # gates conv input channels, sublane-aligned
    cxp = cp - 3                       # padded x-channel count

    # h1/h2/h3 convs -> block-diagonal (3, 9*3*hid) matrix.
    wh = jnp.zeros((3, 9, 3, hid), jnp.float32)
    bh = []
    for i, nm in enumerate(("h1", "h2", "h3")):
        w = params[nm + "_w"][0]                                   # (hid, 3, 3)
        wh = wh.at[i, :, i, :].set(jnp.transpose(w, (1, 2, 0)).reshape(9, hid))
        bh.append(params[nm + "_b"])
    wh = wh.reshape(3, 9 * 3 * hid).astype(mxu_dtype)
    bh = jnp.stack(bh).reshape(3, 1).astype(jnp.float32)

    # gates conv -> (4*hid, 9*cp) with channel layout [x (padded), h1, h2, h3].
    gw = jnp.transpose(params["gates_w"], (0, 2, 3, 1)).reshape(4 * hid, 9, c_in + 3)
    wg = jnp.zeros((4 * hid, 9, cp), jnp.float32)
    wg = wg.at[:, :, :c_in].set(gw[:, :, :c_in])
    wg = wg.at[:, :, cxp:cxp + 3].set(gw[:, :, c_in:])
    wg = wg.reshape(4 * hid, 9 * cp).astype(mxu_dtype)
    bg = params["gates_b"].reshape(4 * hid, 1).astype(jnp.float32)
    return wh, bh, wg, bg, cxp


# ----------------------------------------------------------------------------
# Wrapper: only cheap reshapes / small packing around the kernel.
# ----------------------------------------------------------------------------
def dslstm_pallas(x, prev_hidden3, prev_cell, params, *, use_bf16=True,
                  num_groups=None):
    """x: (B, C_in, H, W); prev_hidden3: (3, B, hid, H, W); prev_cell: (B, hid, H, W)."""
    B, c_in, H, W = x.shape
    hid = prev_cell.shape[1]
    hw = H * W

    # Batch is folded into the lane axis inside each group; the grid has one
    # step per group.  Default 2 groups (even B) so v7x megacore is used.
    if num_groups is None:
        num_groups = 2 if (B % 2 == 0 and B >= 2) else 1
    assert B % num_groups == 0
    bt = B // num_groups
    lanes = bt * hw

    mxu_dtype = jnp.bfloat16 if use_bf16 else jnp.float32
    wh, bh, wg, bg, cxp = _pack_weights(params, c_in, hid, mxu_dtype)

    def fold(a):
        # (B, C, H, W) -> (num_groups, C, bt*hw): channels on sublanes,
        # batch-major flattened spatial on lanes.
        c = a.shape[1]
        return (a.reshape(num_groups, bt, c, hw)
                 .transpose(0, 2, 1, 3)
                 .reshape(num_groups, c, lanes))

    x_t = fold(jnp.pad(x, ((0, 0), (0, cxp - c_in), (0, 0), (0, 0))))
    h_t = fold(jnp.transpose(prev_hidden3, (1, 0, 2, 3, 4)).reshape(B, 3 * hid, H, W))
    c_t = fold(prev_cell)

    # Per-tap validity masks from the within-image position (lane % hw), built
    # once here and fetched once (constant block index).
    p = jnp.arange(lanes, dtype=jnp.int32) % hw
    py, px = p // W, p % W
    rows = []
    for t in range(9):
        if t == 4:
            continue
        oy, ox = t // 3 - 1, t % 3 - 1
        rows.append((py + oy >= 0) & (py + oy < H) & (px + ox >= 0) & (px + ox < W))
    masks = jnp.stack(rows).astype(jnp.float32)                    # (8, lanes)

    kernel = functools.partial(_dslstm_kernel, width=W, mxu_dtype=mxu_dtype)
    const2 = lambda g: (0, 0)
    grid_spec = pltpu.PrefetchScalarGridSpec(
        num_scalar_prefetch=0,
        grid=(num_groups,),
        in_specs=[
            pl.BlockSpec((1, cxp, lanes), lambda g: (g, 0, 0)),
            pl.BlockSpec((1, 3 * hid, lanes), lambda g: (g, 0, 0)),
            pl.BlockSpec((1, hid, lanes), lambda g: (g, 0, 0)),
            pl.BlockSpec(masks.shape, const2),
            pl.BlockSpec(wh.shape, const2),
            pl.BlockSpec(bh.shape, const2),
            pl.BlockSpec(wg.shape, const2),
            pl.BlockSpec(bg.shape, const2),
        ],
        out_specs=pl.BlockSpec((1, 2 * hid, lanes), lambda g: (g, 0, 0)),
    )
    out = pl.pallas_call(
        kernel,
        out_shape=jax.ShapeDtypeStruct((num_groups, 2 * hid, lanes), jnp.float32),
        grid_spec=grid_spec,
        compiler_params=pltpu.CompilerParams(dimension_semantics=("parallel",)),
    )(x_t, h_t, c_t, masks, wh, bh, wg, bg)

    out = (out.reshape(num_groups, 2 * hid, bt, hw)
              .transpose(0, 2, 1, 3)
              .reshape(B, 2 * hid, H, W))
    hidden, cell = out[:, hid:], out[:, :hid]
    return hidden, cell


def dslstm_forward(params, input_, np_feat, h_suv, np_feat_c, c_suv, **kwargs):
    """Mirrors DSLSTM.forward's state-selection flags (glue, plain JAX)."""
    B, _, H, W = input_.shape
    hid = params["hidden_size"]
    zeros = jnp.zeros((B, hid, H, W), jnp.float32)
    prev_cell = np_feat_c if c_suv else zeros
    prev_hidden = jnp.stack([np_feat[i] if h_suv[i] else zeros for i in range(3)])
    return dslstm_pallas(input_, prev_hidden, prev_cell, params, **kwargs)


# ----------------------------------------------------------------------------
# Deterministic parameter init (shapes from the module's __init__; see TODOs).
# ----------------------------------------------------------------------------
def init_params(key, input_size, hidden_size):
    ks = jax.random.split(key, 8)

    def u(k, shape, fan_in):
        bound = 1.0 / (fan_in ** 0.5)
        return jax.random.uniform(k, shape, jnp.float32, -bound, bound)

    p = {"input_size": input_size, "hidden_size": hidden_size}
    fan_h = hidden_size * 9
    p["h1_w"] = u(ks[0], (1, hidden_size, 3, 3), fan_h); p["h1_b"] = u(ks[1], (1,), fan_h)
    p["h2_w"] = u(ks[2], (1, hidden_size, 3, 3), fan_h); p["h2_b"] = u(ks[3], (1,), fan_h)
    p["h3_w"] = u(ks[4], (1, hidden_size, 3, 3), fan_h); p["h3_b"] = u(ks[5], (1,), fan_h)
    gin = input_size + 3
    fan_g = gin * 9
    p["gates_w"] = u(ks[6], (4 * hidden_size, gin, 3, 3), fan_g)
    p["gates_b"] = u(ks[7], (4 * hidden_size,), fan_g)
    return p


# ----------------------------------------------------------------------------
# Pure-JAX (XLA conv) reference of the same forward, for validation.
# mxu_dtype=bfloat16 emulates bf16 MXU operands with f32 accumulation.
# ----------------------------------------------------------------------------
def _conv3x3(x, w, b, dtype):
    y = lax.conv_general_dilated(x.astype(dtype), w.astype(dtype), (1, 1),
                                 ((1, 1), (1, 1)),
                                 dimension_numbers=("NCHW", "OIHW", "NCHW"),
                                 preferred_element_type=jnp.float32)
    return y + b[None, :, None, None]


def dslstm_reference(x, prev_hidden3, prev_cell, params, mxu_dtype=jnp.float32):
    h1 = jax.nn.relu(_conv3x3(prev_hidden3[0], params["h1_w"], params["h1_b"], mxu_dtype))
    h2 = jax.nn.relu(_conv3x3(prev_hidden3[1], params["h2_w"], params["h2_b"], mxu_dtype))
    h3 = jax.nn.relu(_conv3x3(prev_hidden3[2], params["h3_w"], params["h3_b"], mxu_dtype))
    stacked = jnp.concatenate([x, h1, h2, h3], axis=1)
    gates = _conv3x3(stacked, params["gates_w"], params["gates_b"], mxu_dtype)
    ig, rg, og, cg = jnp.split(gates, 4, axis=1)
    cell = jax.nn.sigmoid(rg) * prev_cell + jax.nn.sigmoid(ig) * jnp.tanh(cg)
    hidden = jax.nn.sigmoid(og) * jnp.tanh(cell)
    return hidden, cell


if __name__ == "__main__":
    B, C_in, hid, H, W = 2, 4, 8, 16, 16
    key = jax.random.PRNGKey(0)
    k0, k1, k2, k3 = jax.random.split(key, 4)

    params = init_params(k0, C_in, hid)
    x = jax.random.normal(k1, (B, C_in, H, W), jnp.float32)
    np_feat = [jax.random.normal(jax.random.fold_in(k2, i), (B, hid, H, W), jnp.float32)
               for i in range(3)]
    np_feat_c = jax.random.normal(k3, (B, hid, H, W), jnp.float32)
    h_suv = [True, True, True]
    c_suv = True

    # --- f32 MXU path: tight check against the XLA-conv reference. -----------
    hidden, cell = dslstm_forward(params, x, np_feat, h_suv, np_feat_c, c_suv,
                                  use_bf16=False)
    hidden, cell = jax.block_until_ready((hidden, cell))
    ref_h, ref_c = dslstm_reference(x, jnp.stack(np_feat), np_feat_c, params)
    assert hidden.shape == (B, hid, H, W) and cell.shape == (B, hid, H, W)
    assert jnp.allclose(hidden, ref_h, atol=5e-4, rtol=5e-4)
    assert jnp.allclose(cell, ref_c, atol=5e-4, rtol=5e-4)

    # --- bf16 MXU-operand fast path (v6e/v7x): check against the same math ---
    # --- with bf16 conv operands and f32 accumulation. ------------------------
    hidden_b, cell_b = dslstm_forward(params, x, np_feat, h_suv, np_feat_c, c_suv,
                                      use_bf16=True)
    hidden_b, cell_b = jax.block_until_ready((hidden_b, cell_b))
    ref_hb, ref_cb = dslstm_reference(x, jnp.stack(np_feat), np_feat_c, params,
                                      mxu_dtype=jnp.bfloat16)
    assert jnp.allclose(hidden_b, ref_hb, atol=5e-3, rtol=5e-3)
    assert jnp.allclose(cell_b, ref_cb, atol=5e-3, rtol=5e-3)

    print("KERNEL_OK")
</pallas_src>

<mosaic_0001>
module attributes {stable_mosaic.version = 11 : i64} {
  func.func @_dslstm_kernel(%arg0: i32, %arg1: memref<1x5x256xf32, #tpu.memory_space<vmem>>, %arg2: memref<1x24x256xf32, #tpu.memory_space<vmem>>, %arg3: memref<1x8x256xf32, #tpu.memory_space<vmem>>, %arg4: memref<8x256xf32, #tpu.memory_space<vmem>>, %arg5: memref<3x216xf32, #tpu.memory_space<vmem>>, %arg6: memref<3x1xf32, #tpu.memory_space<vmem>>, %arg7: memref<32x72xf32, #tpu.memory_space<vmem>>, %arg8: memref<32x1xf32, #tpu.memory_space<vmem>>, %arg9: memref<1x16x256xf32, #tpu.memory_space<vmem>>) attributes {dimension_semantics = [#tpu.dimension_semantics<parallel>], iteration_bounds = array<i64: 2>, scalar_prefetch = 0 : i64, scratch_operands = 0 : i64, tpu.core_type = #tpu.core_type<tc>, window_params = [{transform_indices = @transform_0, window_bounds = array<i64: 1, 5, 256>}, {transform_indices = @transform_1, window_bounds = array<i64: 1, 24, 256>}, {transform_indices = @transform_2, window_bounds = array<i64: 1, 8, 256>}, {pipeline_mode = #tpu.pipeline_mode<synchronous>, transform_indices = @transform_3, window_bounds = array<i64: 8, 256>}, {pipeline_mode = #tpu.pipeline_mode<synchronous>, transform_indices = @transform_4, window_bounds = array<i64: 3, 216>}, {pipeline_mode = #tpu.pipeline_mode<synchronous>, transform_indices = @transform_5, window_bounds = array<i64: 3, 1>}, {pipeline_mode = #tpu.pipeline_mode<synchronous>, transform_indices = @transform_6, window_bounds = array<i64: 32, 72>}, {pipeline_mode = #tpu.pipeline_mode<synchronous>, transform_indices = @transform_7, window_bounds = array<i64: 32, 1>}, {transform_indices = @transform_8, window_bounds = array<i64: 1, 16, 256>}]} {
    %c0 = arith.constant 0 : index
    %c0_0 = arith.constant 0 : index
    %c0_1 = arith.constant 0 : index
    %0 = vector.load %arg1[%c0, %c0_0, %c0_1] : memref<1x5x256xf32, #tpu.memory_space<vmem>>, vector<1x5x256xf32>
    %1 = vector.shape_cast %0 : vector<1x5x256xf32> to vector<5x256xf32>
    %c0_2 = arith.constant 0 : index
    %c0_3 = arith.constant 0 : index
    %c0_4 = arith.constant 0 : index
    %2 = vector.load %arg2[%c0_2, %c0_3, %c0_4] : memref<1x24x256xf32, #tpu.memory_space<vmem>>, vector<1x24x256xf32>
    %3 = vector.shape_cast %2 : vector<1x24x256xf32> to vector<24x256xf32>
    %c0_5 = arith.constant 0 : index
    %c0_6 = arith.constant 0 : index
    %c0_7 = arith.constant 0 : index
    %4 = vector.load %arg3[%c0_5, %c0_6, %c0_7] : memref<1x8x256xf32, #tpu.memory_space<vmem>>, vector<1x8x256xf32>
    %5 = vector.shape_cast %4 : vector<1x8x256xf32> to vector<8x256xf32>
    %c0_8 = arith.constant 0 : index
    %c0_9 = arith.constant 0 : index
    %6 = vector.load %arg4[%c0_8, %c0_9] : memref<8x256xf32, #tpu.memory_space<vmem>>, vector<8x256xf32>
    %c0_10 = arith.constant 0 : index
    %c0_11 = arith.constant 0 : index
    %7 = vector.load %arg5[%c0_10, %c0_11] : memref<3x216xf32, #tpu.memory_space<vmem>>, vector<3x216xf32>
    %c17_i32 = arith.constant 17 : i32
    %8 = tpu.dynamic_rotate %3 by %c17_i32 dim 1 : vector<24x256xf32>, i32 -> vector<24x256xf32>
    %9 = vector.extract_strided_slice %6 {offsets = [0, 0], sizes = [1, 256], strides = [1, 1]} : vector<8x256xf32> to vector<1x256xf32>
    %10 = vector.broadcast %9 : vector<1x256xf32> to vector<24x256xf32>
    %11 = arith.mulf %8, %10 : vector<24x256xf32>
    %c16_i32 = arith.constant 16 : i32
    %12 = tpu.dynamic_rotate %3 by %c16_i32 dim 1 : vector<24x256xf32>, i32 -> vector<24x256xf32>
    %13 = vector.extract_strided_slice %6 {offsets = [1, 0], sizes = [1, 256], strides = [1, 1]} : vector<8x256xf32> to vector<1x256xf32>
    %14 = vector.broadcast %13 : vector<1x256xf32> to vector<24x256xf32>
    %15 = arith.mulf %12, %14 : vector<24x256xf32>
    %c15_i32 = arith.constant 15 : i32
    %16 = tpu.dynamic_rotate %3 by %c15_i32 dim 1 : vector<24x256xf32>, i32 -> vector<24x256xf32>
    %17 = vector.extract_strided_slice %6 {offsets = [2, 0], sizes = [1, 256], strides = [1, 1]} : vector<8x256xf32> to vector<1x256xf32>
    %18 = vector.broadcast %17 : vector<1x256xf32> to vector<24x256xf32>
    %19 = arith.mulf %16, %18 : vector<24x256xf32>
    %c1_i32 = arith.constant 1 : i32
    %20 = tpu.dynamic_rotate %3 by %c1_i32 dim 1 : vector<24x256xf32>, i32 -> vector<24x256xf32>
    %21 = vector.extract_strided_slice %6 {offsets = [3, 0], sizes = [1, 256], strides = [1, 1]} : vector<8x256xf32> to vector<1x256xf32>
    %22 = vector.broadcast %21 : vector<1x256xf32> to vector<24x256xf32>
    %23 = arith.mulf %20, %22 : vector<24x256xf32>
    %c255_i32 = arith.constant 255 : i32
    %24 = tpu.dynamic_rotate %3 by %c255_i32 dim 1 : vector<24x256xf32>, i32 -> vector<24x256xf32>
    %25 = vector.extract_strided_slice %6 {offsets = [4, 0], sizes = [1, 256], strides = [1, 1]} : vector<8x256xf32> to vector<1x256xf32>
    %26 = vector.broadcast %25 : vector<1x256xf32> to vector<24x256xf32>
    %27 = arith.mulf %24, %26 : vector<24x256xf32>
    %c241_i32 = arith.constant 241 : i32
    %28 = tpu.dynamic_rotate %3 by %c241_i32 dim 1 : vector<24x256xf32>, i32 -> vector<24x256xf32>
    %29 = vector.extract_strided_slice %6 {offsets = [5, 0], sizes = [1, 256], strides = [1, 1]} : vector<8x256xf32> to vector<1x256xf32>
    %30 = vector.broadcast %29 : vector<1x256xf32> to vector<24x256xf32>
    %31 = arith.mulf %28, %30 : vector<24x256xf32>
    %c240_i32 = arith.constant 240 : i32
    %32 = tpu.dynamic_rotate %3 by %c240_i32 dim 1 : vector<24x256xf32>, i32 -> vector<24x256xf32>
    %33 = vector.extract_strided_slice %6 {offsets = [6, 0], sizes = [1, 256], strides = [1, 1]} : vector<8x256xf32> to vector<1x256xf32>
    %34 = vector.broadcast %33 : vector<1x256xf32> to vector<24x256xf32>
    %35 = arith.mulf %32, %34 : vector<24x256xf32>
    %c239_i32 = arith.constant 239 : i32
    %36 = tpu.dynamic_rotate %3 by %c239_i32 dim 1 : vector<24x256xf32>, i32 -> vector<24x256xf32>
    %37 = vector.extract_strided_slice %6 {offsets = [7, 0], sizes = [1, 256], strides = [1, 1]} : vector<8x256xf32> to vector<1x256xf32>
    %38 = vector.broadcast %37 : vector<1x256xf32> to vector<24x256xf32>
    %39 = arith.mulf %36, %38 : vector<24x256xf32>
    %40 = tpu.concatenate %11, %15, %19, %23, %3, %27, %31, %35, %39 in 0 : vector<24x256xf32>, vector<24x256xf32>, vector<24x256xf32>, vector<24x256xf32>, vector<24x256xf32>, vector<24x256xf32>, vector<24x256xf32>, vector<24x256xf32>, vector<24x256xf32> -> vector<216x256xf32>
    %cst = arith.constant dense<0.000000e+00> : vector<3x256xf32>
    %41 = tpu.matmul %7, %40, %cst {dimension_numbers = #tpu.dot_dimension_numbers<[1], [0], [0], [1], [0, 0, 1, 1], [], []>} : vector<3x216xf32>, vector<216x256xf32>, vector<3x256xf32> -> vector<3x256xf32>
    %c0_12 = arith.constant 0 : index
    %c0_13 = arith.constant 0 : index
    %42 = vector.load %arg6[%c0_12, %c0_13] : memref<3x1xf32, #tpu.memory_space<vmem>>, vector<3x1xf32>
    %43 = vector.broadcast %42 : vector<3x1xf32> to vector<3x256xf32>
    %44 = arith.addf %41, %43 : vector<3x256xf32>
    %cst_14 = arith.constant 0.000000e+00 : f32
    %45 = vector.broadcast %cst_14 : f32 to vector<3x256xf32>
    %46 = arith.maximumf %44, %45 : vector<3x256xf32>
    %c0_15 = arith.constant 0 : index
    %c0_16 = arith.constant 0 : index
    %47 = vector.load %arg7[%c0_15, %c0_16] : memref<32x72xf32, #tpu.memory_space<vmem>>, vector<32x72xf32>
    %48 = tpu.concatenate %1, %46 in 0 : vector<5x256xf32>, vector<3x256xf32> -> vector<8x256xf32>
    %c17_i32_17 = arith.constant 17 : i32
    %49 = tpu.dynamic_rotate %48 by %c17_i32_17 dim 1 : vector<8x256xf32>, i32 -> vector<8x256xf32>
    %50 = vector.extract_strided_slice %6 {offsets = [0, 0], sizes = [1, 256], strides = [1, 1]} : vector<8x256xf32> to vector<1x256xf32>
    %51 = vector.broadcast %50 : vector<1x256xf32> to vector<8x256xf32>
    %52 = arith.mulf %49, %51 : vector<8x256xf32>
    %c16_i32_18 = arith.constant 16 : i32
    %53 = tpu.dynamic_rotate %48 by %c16_i32_18 dim 1 : vector<8x256xf32>, i32 -> vector<8x256xf32>
    %54 = vector.extract_strided_slice %6 {offsets = [1, 0], sizes = [1, 256], strides = [1, 1]} : vector<8x256xf32> to vector<1x256xf32>
    %55 = vector.broadcast %54 : vector<1x256xf32> to vector<8x256xf32>
    %56 = arith.mulf %53, %55 : vector<8x256xf32>
    %c15_i32_19 = arith.constant 15 : i32
    %57 = tpu.dynamic_rotate %48 by %c15_i32_19 dim 1 : vector<8x256xf32>, i32 -> vector<8x256xf32>
    %58 = vector.extract_strided_slice %6 {offsets = [2, 0], sizes = [1, 256], strides = [1, 1]} : vector<8x256xf32> to vector<1x256xf32>
    %59 = vector.broadcast %58 : vector<1x256xf32> to vector<8x256xf32>
    %60 = arith.mulf %57, %59 : vector<8x256xf32>
    %c1_i32_20 = arith.constant 1 : i32
    %61 = tpu.dynamic_rotate %48 by %c1_i32_20 dim 1 : vector<8x256xf32>, i32 -> vector<8x256xf32>
    %62 = vector.extract_strided_slice %6 {offsets = [3, 0], sizes = [1, 256], strides = [1, 1]} : vector<8x256xf32> to vector<1x256xf32>
    %63 = vector.broadcast %62 : vector<1x256xf32> to vector<8x256xf32>
    %64 = arith.mulf %61, %63 : vector<8x256xf32>
    %c255_i32_21 = arith.constant 255 : i32
    %65 = tpu.dynamic_rotate %48 by %c255_i32_21 dim 1 : vector<8x256xf32>, i32 -> vector<8x256xf32>
    %66 = vector.extract_strided_slice %6 {offsets = [4, 0], sizes = [1, 256], strides = [1, 1]} : vector<8x256xf32> to vector<1x256xf32>
    %67 = vector.broadcast %66 : vector<1x256xf32> to vector<8x256xf32>
    %68 = arith.mulf %65, %67 : vector<8x256xf32>
    %c241_i32_22 = arith.constant 241 : i32
    %69 = tpu.dynamic_rotate %48 by %c241_i32_22 dim 1 : vector<8x256xf32>, i32 -> vector<8x256xf32>
    %70 = vector.extract_strided_slice %6 {offsets = [5, 0], sizes = [1, 256], strides = [1, 1]} : vector<8x256xf32> to vector<1x256xf32>
    %71 = vector.broadcast %70 : vector<1x256xf32> to vector<8x256xf32>
    %72 = arith.mulf %69, %71 : vector<8x256xf32>
    %c240_i32_23 = arith.constant 240 : i32
    %73 = tpu.dynamic_rotate %48 by %c240_i32_23 dim 1 : vector<8x256xf32>, i32 -> vector<8x256xf32>
    %74 = vector.extract_strided_slice %6 {offsets = [6, 0], sizes = [1, 256], strides = [1, 1]} : vector<8x256xf32> to vector<1x256xf32>
    %75 = vector.broadcast %74 : vector<1x256xf32> to vector<8x256xf32>
    %76 = arith.mulf %73, %75 : vector<8x256xf32>
    %c239_i32_24 = arith.constant 239 : i32
    %77 = tpu.dynamic_rotate %48 by %c239_i32_24 dim 1 : vector<8x256xf32>, i32 -> vector<8x256xf32>
    %78 = vector.extract_strided_slice %6 {offsets = [7, 0], sizes = [1, 256], strides = [1, 1]} : vector<8x256xf32> to vector<1x256xf32>
    %79 = vector.broadcast %78 : vector<1x256xf32> to vector<8x256xf32>
    %80 = arith.mulf %77, %79 : vector<8x256xf32>
    %81 = tpu.concatenate %52, %56, %60, %64, %48, %68, %72, %76, %80 in 0 : vector<8x256xf32>, vector<8x256xf32>, vector<8x256xf32>, vector<8x256xf32>, vector<8x256xf32>, vector<8x256xf32>, vector<8x256xf32>, vector<8x256xf32>, vector<8x256xf32> -> vector<72x256xf32>
    %cst_25 = arith.constant dense<0.000000e+00> : vector<32x256xf32>
    %82 = tpu.matmul %47, %81, %cst_25 {dimension_numbers = #tpu.dot_dimension_numbers<[1], [0], [0], [1], [0, 0, 1, 1], [], []>} : vector<32x72xf32>, vector<72x256xf32>, vector<32x256xf32> -> vector<32x256xf32>
    %c0_26 = arith.constant 0 : index
    %c0_27 = arith.constant 0 : index
    %83 = vector.load %arg8[%c0_26, %c0_27] : memref<32x1xf32, #tpu.memory_space<vmem>>, vector<32x1xf32>
    %84 = vector.broadcast %83 : vector<32x1xf32> to vector<32x256xf32>
    %85 = arith.addf %82, %84 : vector<32x256xf32>
    %86 = vector.extract_strided_slice %85 {offsets = [0, 0], sizes = [8, 256], strides = [1, 1]} : vector<32x256xf32> to vector<8x256xf32>
    %cst_28 = arith.constant 5.000000e-01 : f32
    %87 = vector.broadcast %cst_28 : f32 to vector<8x256xf32>
    %88 = arith.mulf %87, %86 : vector<8x256xf32>
    %89 = math.tanh %88 : vector<8x256xf32>
    %cst_29 = arith.constant 1.000000e+00 : f32
    %90 = vector.broadcast %cst_29 : f32 to vector<8x256xf32>
    %91 = arith.addf %90, %89 : vector<8x256xf32>
    %cst_30 = arith.constant 5.000000e-01 : f32
    %92 = vector.broadcast %cst_30 : f32 to vector<8x256xf32>
    %93 = arith.mulf %92, %91 : vector<8x256xf32>
    %94 = vector.extract_strided_slice %85 {offsets = [8, 0], sizes = [8, 256], strides = [1, 1]} : vector<32x256xf32> to vector<8x256xf32>
    %cst_31 = arith.constant 5.000000e-01 : f32
    %95 = vector.broadcast %cst_31 : f32 to vector<8x256xf32>
    %96 = arith.mulf %95, %94 : vector<8x256xf32>
    %97 = math.tanh %96 : vector<8x256xf32>
    %cst_32 = arith.constant 1.000000e+00 : f32
    %98 = vector.broadcast %cst_32 : f32 to vector<8x256xf32>
    %99 = arith.addf %98, %97 : vector<8x256xf32>
    %cst_33 = arith.constant 5.000000e-01 : f32
    %100 = vector.broadcast %cst_33 : f32 to vector<8x256xf32>
    %101 = arith.mulf %100, %99 : vector<8x256xf32>
    %102 = vector.extract_strided_slice %85 {offsets = [16, 0], sizes = [8, 256], strides = [1, 1]} : vector<32x256xf32> to vector<8x256xf32>
    %cst_34 = arith.constant 5.000000e-01 : f32
    %103 = vector.broadcast %cst_34 : f32 to vector<8x256xf32>
    %104 = arith.mulf %103, %102 : vector<8x256xf32>
    %105 = math.tanh %104 : vector<8x256xf32>
    %cst_35 = arith.constant 1.000000e+00 : f32
    %106 = vector.broadcast %cst_35 : f32 to vector<8x256xf32>
    %107 = arith.addf %106, %105 : vector<8x256xf32>
    %cst_36 = arith.constant 5.000000e-01 : f32
    %108 = vector.broadcast %cst_36 : f32 to vector<8x256xf32>
    %109 = arith.mulf %108, %107 : vector<8x256xf32>
    %110 = vector.extract_strided_slice %85 {offsets = [24, 0], sizes = [8, 256], strides = [1, 1]} : vector<32x256xf32> to vector<8x256xf32>
    %111 = math.tanh %110 : vector<8x256xf32>
    %112 = arith.mulf %101, %5 : vector<8x256xf32>
    %113 = arith.mulf %93, %111 : vector<8x256xf32>
    %114 = arith.addf %112, %113 : vector<8x256xf32>
    %115 = math.tanh %114 : vector<8x256xf32>
    %116 = arith.mulf %109, %115 : vector<8x256xf32>
    %117 = tpu.concatenate %114, %116 in 0 : vector<8x256xf32>, vector<8x256xf32> -> vector<16x256xf32>
    %c0_37 = arith.constant 0 : index
    %c0_38 = arith.constant 0 : index
    %c0_39 = arith.constant 0 : index
    %118 = vector.load %arg9[%c0_37, %c0_38, %c0_39] : memref<1x16x256xf32, #tpu.memory_space<vmem>>, vector<1x16x256xf32>
    %119 = vector.shape_cast %118 : vector<1x16x256xf32> to vector<16x256xf32>
    %120 = vector.shape_cast %117 : vector<16x256xf32> to vector<1x16x256xf32>
    tpu.vector_store %arg9[%c0_37, %c0_38, %c0_39], %120 {strides = array<i32>} : memref<1x16x256xf32, #tpu.memory_space<vmem>>, vector<1x16x256xf32>,
    return
  }
  func.func @transform_0(%arg0: i32) -> (i32, i32, i32) {
    %c0_i32 = arith.constant 0 : i32
    %c0_i32_0 = arith.constant 0 : i32
    %c0_i32_1 = arith.constant 0 : i32
    return %arg0, %c0_i32, %c0_i32_0 : i32, i32, i32
  }
  func.func @transform_1(%arg0: i32) -> (i32, i32, i32) {
    %c0_i32 = arith.constant 0 : i32
    %c0_i32_0 = arith.constant 0 : i32
    %c0_i32_1 = arith.constant 0 : i32
    return %arg0, %c0_i32, %c0_i32_0 : i32, i32, i32
  }
  func.func @transform_2(%arg0: i32) -> (i32, i32, i32) {
    %c0_i32 = arith.constant 0 : i32
    %c0_i32_0 = arith.constant 0 : i32
    %c0_i32_1 = arith.constant 0 : i32
    return %arg0, %c0_i32, %c0_i32_0 : i32, i32, i32
  }
  func.func @transform_3(%arg0: i32) -> (i32, i32) {
    %c0_i32 = arith.constant 0 : i32
    %c0_i32_0 = arith.constant 0 : i32
    %c0_i32_1 = arith.constant 0 : i32
    return %c0_i32, %c0_i32_0 : i32, i32
  }
  func.func @transform_4(%arg0: i32) -> (i32, i32) {
    %c0_i32 = arith.constant 0 : i32
    %c0_i32_0 = arith.constant 0 : i32
    %c0_i32_1 = arith.constant 0 : i32
    return %c0_i32, %c0_i32_0 : i32, i32
  }
  func.func @transform_5(%arg0: i32) -> (i32, i32) {
    %c0_i32 = arith.constant 0 : i32
    %c0_i32_0 = arith.constant 0 : i32
    %c0_i32_1 = arith.constant 0 : i32
    return %c0_i32, %c0_i32_0 : i32, i32
  }
  func.func @transform_6(%arg0: i32) -> (i32, i32) {
    %c0_i32 = arith.constant 0 : i32
    %c0_i32_0 = arith.constant 0 : i32
    %c0_i32_1 = arith.constant 0 : i32
    return %c0_i32, %c0_i32_0 : i32, i32
  }
  func.func @transform_7(%arg0: i32) -> (i32, i32) {
    %c0_i32 = arith.constant 0 : i32
    %c0_i32_0 = arith.constant 0 : i32
    %c0_i32_1 = arith.constant 0 : i32
    return %c0_i32, %c0_i32_0 : i32, i32
  }
  func.func @transform_8(%arg0: i32) -> (i32, i32, i32) {
    %c0_i32 = arith.constant 0 : i32
    %c0_i32_0 = arith.constant 0 : i32
    %c0_i32_1 = arith.constant 0 : i32
    return %arg0, %c0_i32, %c0_i32_0 : i32, i32, i32
  }
}

</mosaic_0001>

<bundles_post_ra>
// kernel: tpu_custom_call.1
= control target key start
LH: loop header
LB: loop body
LE: loop exit
PB: predicated region body
PF: predicated region fallthrough
CT: control target
= control target key end

     0   :  { %13 = vsyncpa [#allocation3], 0  ;;  %s1878_s0 = inlined_call_operand.vmem [shape: f32[2,5,256], index: 0, kind: input, shape index: {}]   ;;  %s1879_s1 = inlined_call_operand.hbm [shape: f32[2,24,256], index: 1, kind: input, shape index: {}]   ;;  %s1880_s2 = inlined_call_operand.vmem [shape: f32[2,8,256], index: 2, kind: input, shape index: {}]   ;;  %s1881_s3 = inlined_call_operand.vmem [shape: f32[8,256], index: 3, kind: input, shape index: {}]   ;;  %s1882_s4 = inlined_call_operand.vmem [shape: f32[3,216], index: 4, kind: input, shape index: {}]   ;;  %s1883_s5 = inlined_call_operand.vmem [shape: f32[3,1], index: 5, kind: input, shape index: {}]   ;;  %s1884_s6 = inlined_call_operand.vmem [shape: f32[32,72], index: 6, kind: input, shape index: {}]   ;;  %s1885_s7 = inlined_call_operand.vmem [shape: f32[32,1], index: 7, kind: input, shape index: {}]   ;;  %s1886_s8 = inlined_call_operand.hbm [shape: f32[2,16,256], index: 8, kind: output, shape index: {}]  }
   0x1   :  { %15 = vsyncpa [#allocation3 + $0x1], 0 }
   0x2   :  { %16 = vsyncpa [#allocation4], 0 }
   0x3   :  { %18 = vsyncpa [#allocation4 + $0x1], 0  ;;  %s1285_s27 = smov 0   ;;  %s1287_s28 = smov 0  }
   0x4   :  { %s1289_s29 = smov 0   ;;  %s1291_s30 = smov 0  }
   0x5 LB: > { %1890 = sst [smem:[#allocation8_spill]] %s1222_s29  ;;  %s1306_s9 = sadd.s32 4294967295, %s1226_s30   ;;  %s1226_s30 = sphi %s1291_s30, %s1897_s30   ;;  %s1222_s29 = sphi %s1289_s29, %s1899_s29   ;;  %s1218_s28 = sphi %s1287_s28, %s1901_s28   ;;  %s1214_s27 = sphi %s1285_s27, %s1900_s27  }
   0x6   : > { %s1018_s10 = sadd.s32 4294967294, %s1226_s30   ;;  %s1310_s11 = sadd.s32 1, %s1226_s30  }
   0x7   : > { %1891 = sst [smem:[#allocation9_spill]] %s1310_s11  ;;  %s57_s12 = sadd.s32 1, %s1222_s29 }
   0x8   : > { %s54_s13 = ssub.s32 %s1226_s30, %s1310_s11  ;;  %p64_p0 = scmp.ne.s32.totalorder %s1222_s29, %s1218_s28 }
   0x9   : > { %p55_p1 = scmp.eq.s32.totalorder %s54_s13, 0  ;;  %p65_p2 = scmp.eq.s32.totalorder %s1226_s30, 0 }
   0xa   : > { %p70_p3 = scmp.ne.s32.totalorder %s1218_s28, %s1214_s27  ;;  %p71_p4 = scmp.eq.s32.totalorder %s1306_s9, 0 }
   0xb   : > { %s1322_s14 = scalar_select %p55_p1, %s1222_s29, %s57_s12  }
   0xc   : > { %p66_p5 = por %p65_p2, %p64_p0  ;;  %p1324_p6 = por %p71_p4, %p70_p3 }
   0xd   : > { %1892 = sst [smem:[#allocation10_spill]] %s1322_s14  ;;  %p225_p7 = scmp.eq.s32.totalorder %s1306_s9, 1 }
   0xe   : > { %p231_p8 = scmp.eq.s32.totalorder %s1018_s10, 1  ;;  %p1020_p9 = scmp.ge.s32.totalorder %s1226_s30, 2 }
   0xf   : > { %p1061_p10 = scmp.lt.s32.totalorder %s1226_s30, 2  ;;  %p1331_p11 = por %p225_p7, %p64_p0 }
  0x10   : > { %p1335_p12 = por %p231_p8, %p70_p3  ;;  %s274_s18 = sand.u32 1, %s1222_s29  }
  0x11   : > { %s1047_s19 = smul.u32 48, %s1226_s30  ;;  %p1344_p13 = pnand %p1061_p10, %p66_p5 }
  0x12   : > { %s1046_s20 = smul.u32 48, %s274_s18  ;;  %s275_s12 = scalar_lea.sflag [#allocation3], %s274_s18 }
  0x13   : > { %s283_s23 = scalar_lea.hbm %s1879_s1, %s1047_s19  ;;  %p1134_p1 = pneg %p1344_p13 }
  0x14   : > { %s284_s25 = sshll.u32 %s283_s23, 4  ;;  %s278_s26 = scalar_lea.vmem [#allocation2], %s1046_s20  ;;  %s285_s25 = int_to_ptr.hbm [resolvable:$true] %s284_s25 }
  0x15   : > { %s286_s10 = sshll.u32 %s278_s26, 4  ;;  %s1130_s13 = sshra.s32 %s285_s25, 4  ;;  %s287_s10 = int_to_ptr.vmem [resolvable:$true] %s286_s10  ;;  %s1131_s13 = int_to_ptr.hbm [resolvable:$true] %s1130_s13 }
  0x16   : > { %s1132_s14 = scalar_lea.hbm %s1131_s13, 48  ;;  %s1137_s22 = scalar_lea.hbm %s1879_s1, 96 }
  0x17   : > { %p1133_p0 = scmp.ne.s32.totalorder %s1131_s13, %s1132_s14  ;;  %p1138_p4 = scmp.lt.s32.totalorder %s1131_s13, %s1879_s1 }
  0x18   : > { %p1139_p5 = scmp.lt.s32.totalorder %s1137_s22, %s1132_s14 }
  0x19   : > { %p1135_p2 = pnand %p1134_p1, %p1133_p0 }
  0x1a   : > { %p1140_p7 = por %p1139_p5, %p1138_p4 }
  0x1b   : > { %p1136_p3 = pneg %p1135_p2 }
  0x1d   : > { %p1141_p8 = pnand %p1140_p7, %p1136_p3 }
  0x1f   : > { %1144 = shalt.err (!%p1141_p8)
}
  0x20   : > { %s1228_s18 = smov 256   ;;  %s1229_s20 = smov 16  }
  0x21   : > { %1056 = dma.hbm_to_vmem [thread:$0]  (!%p1344_p13), %s285_s25, 768, %s287_s10, %s275_s12, %s1228_s18, %s1228_s18, %s1229_s20  }
  0x22   : > { %p1022_p10 = scmp.ge.s32.totalorder %s1226_s30, 1  ;;  %p302_p0 = scmp.lt.s32.totalorder %s1226_s30, 3 }
  0x24   : > { %p303_p1 = pnand %p1022_p10, %p302_p0 }
  0x25   : > { %s1361_s23 = sand.u32 (!%p303_p1), 1, %s1218_s28  }
  0x26   : > { %306 = sbr.rel (%p303_p1) target bundleno = 762 (0x2fa), region = 52  ;;  %s309_s11 = scalar_lea.sflag (!%p303_p1), [#allocation3], %s1361_s23 }
  0x27   : > { %s1048_s29 = smul.u32 (!%p303_p1), 48, %s1361_s23 }
  0x29   : > { %s312_s14 = scalar_lea.vmem (!%p303_p1), [#allocation2], %s1048_s29 }
  0x2b   : > { %1205 = dma.done.wait (%p1324_p6), %s309_s11, 768  }
  0x2c   : > { %1207 = vsyncadd (%p1324_p6), %s309_s11, 4294966528  ;;  %v1369_v0 = vld [vmem:[%s312_s14 + $0x20] sm:$0xff]  ;;  %s1230_s24 = smov 1   ;;  %s1231_s25 = smov 127   ;;  %v1377_v2 = vld [vmem:[%s312_s14 + $0x10] sm:$0xff]  ;;  %v391_v11 = vlaneseq  ;;  %vm608_vm8 = vcmask 719872  }
  0x2d   : > { %v1371_v1 = vld [vmem:[%s312_s14] sm:$0xff]  ;;  %466 = vrot.lane.b32.xlu1 %v1369_v0, %s1230_s24  ;;  %464 = vrot.lane.b32.xlu2 %v1377_v2, %s1230_s24  ;;  %v1381_v3 = vld [vmem:[%s312_s14 + $0x28] sm:$0xff]  ;;  %s1232_s15 = smov 15   ;;  %s1233_s26 = smov 111   ;;  %vm703_vm9 = vcmask 1044480   ;;  %vm794_vm10 = vcmask 588800  }
  0x2e   : > { %489 = vrot.lane.b32.xlu0 %v1371_v1, %s1231_s25  ;;  %v1383_v4 = vld [vmem:[%s312_s14 + $0x8] sm:$0xff]  ;;  %v1385_v5 = vld [vmem:[%s312_s14 + $0x18] sm:$0xff]  ;;  %s1234_s10 = smov 16   ;;  %s1235_s12 = smov 112   ;;  %v1473_v13 = vand.u32 127, %v391_v11  ;;  %v1483_v15 = vld [vmem:[%s1881_s3 + $0x8] sm:$0xff] }
  0x2f   : > { %s1236_s13 = smov 17   ;;  %s1237_s19 = smov 113   ;;  %v1478_v14 = vld [vmem:[%s1881_s3] sm:$0xff]  ;;  %v1494_v17 = vperm.slane %v1483_v15, 4  ;;  %v1519_v30 = vperm.slane %v1483_v15, 3  ;;  %v1542_v43 = vperm.slane %v1483_v15, 2 }
  0x30   : > { %vm501_vm0 = vcmp.lt.s32.totalorder %v1473_v13, 127  ;;  %v1491_v16 = vperm.slane %v1478_v14, 4  ;;  %vm474_vm1 = vcmp.lt.s32.totalorder %v1473_v13, 1  ;;  %v1516_v29 = vperm.slane %v1478_v14, 3  ;;  %p356_p6 = scmp.lt.s32.totalorder %s1306_s9, 1 }
  0x31   : > { %vm447_vm2 = vcmp.lt.s32.totalorder %v1473_v13, 15  ;;  %v1539_v42 = vperm.slane %v1478_v14, 2  ;;  %vm420_vm3 = vcmp.lt.s32.totalorder %v1473_v13, 16  ;;  %v1568_v62 = vperm.slane %v1478_v14, 1 }
  0x32   : > { %v1571_v63 = vperm.slane %v1483_v15, 1  ;;  %vm393_vm4 = vcmp.lt.s32.totalorder %v1473_v13, 17  ;;  %vm582_vm5 = vcmp.lt.s32.totalorder %v1473_v13, 111  ;;  %vm555_vm6 = vcmp.lt.s32.totalorder %v1473_v13, 112  ;;  %s1731_s22 = scalar_select %p356_p6, %s1306_s9, 1 }
  0x33   : > { %vm528_vm7 = vcmp.lt.s32.totalorder %v1473_v13, 113  ;;  %v695_v13 = vld [vmem:[%s1884_s6 + $0x10] sm:$0xff] }
  0x34   : > { %s1043_s18 = sshll.u32 %s1731_s22, 4 }
  0x35   : > { %472 = vrot.lane.b32.xlu1 %v1381_v3, %s1230_s24  ;;  %470 = vrot.lane.b32.xlu2 %v1385_v5, %s1230_s24  ;;  %s360_s11 = scalar_lea.vmem %s1878_s0, %s1043_s18 }
  0x36   : > { %495 = vrot.lane.b32.xlu0 %v1383_v4, %s1231_s25 }
  0x3d   : > { %468 = vrot.lane.b32.xlu1 %v1383_v4, %s1230_s24  ;;  %439 = vrot.lane.b32.xlu2 %v1369_v0, %s1232_s15 }
  0x3e   : > { %462 = vrot.lane.b32.xlu0 %v1371_v1, %s1230_s24 }
  0x45   : > { %437 = vrot.lane.b32.xlu1 %v1377_v2, %s1232_s15  ;;  %443 = vrot.lane.b32.xlu2 %v1385_v5, %s1232_s15 }
  0x46   : > { %445 = vrot.lane.b32.xlu0 %v1381_v3, %s1232_s15 }
  0x4d   : > { %441 = vrot.lane.b32.xlu1 %v1383_v4, %s1232_s15  ;;  %574 = vrot.lane.b32.xlu2 %v1369_v0, %s1233_s26 }
  0x4e   : > { %435 = vrot.lane.b32.xlu0 %v1371_v1, %s1232_s15 }
  0x55   : > { %412 = vrot.lane.b32.xlu1 %v1369_v0, %s1234_s10  ;;  %418 = vrot.lane.b32.xlu2 %v1381_v3, %s1234_s10 }
  0x56   : > { %580 = vrot.lane.b32.xlu0 %v1381_v3, %s1233_s26 }
  0x5d   : > { %578 = vrot.lane.b32.xlu1 %v1385_v5, %s1233_s26  ;;  %410 = vrot.lane.b32.xlu2 %v1377_v2, %s1234_s10 }
  0x5e   : > { %572 = vrot.lane.b32.xlu0 %v1377_v2, %s1233_s26 }
  0x65   : > { %570 = vrot.lane.b32.xlu1 %v1371_v1, %s1233_s26  ;;  %576 = vrot.lane.b32.xlu2 %v1383_v4, %s1233_s26 }
  0x66   : > { %416 = vrot.lane.b32.xlu0 %v1385_v5, %s1234_s10 }
  0x6d   : > { %414 = vrot.lane.b32.xlu1 %v1383_v4, %s1234_s10  ;;  %547 = vrot.lane.b32.xlu2 %v1369_v0, %s1235_s12 }
  0x6e   : > { %408 = vrot.lane.b32.xlu0 %v1371_v1, %s1234_s10 }
  0x75   : > { %383 = vrot.lane.b32.xlu1 %v1369_v0, %s1236_s13  ;;  %389 = vrot.lane.b32.xlu2 %v1381_v3, %s1236_s13 }
  0x76   : > { %553 = vrot.lane.b32.xlu0 %v1381_v3, %s1235_s12 }
  0x7d   : > { %551 = vrot.lane.b32.xlu1 %v1385_v5, %s1235_s12  ;;  %381 = vrot.lane.b32.xlu2 %v1377_v2, %s1236_s13 }
  0x7e   : > { %545 = vrot.lane.b32.xlu0 %v1377_v2, %s1235_s12 }
  0x85   : > { %543 = vrot.lane.b32.xlu1 %v1371_v1, %s1235_s12  ;;  %549 = vrot.lane.b32.xlu2 %v1383_v4, %s1235_s12 }
  0x86   : > { %387 = vrot.lane.b32.xlu0 %v1385_v5, %s1236_s13 }
  0x87   : > { %v465_v6 = vpop.permute.xlu2 %464 }
  0x8d   : > { %385 = vrot.lane.b32.xlu1 %v1383_v4, %s1236_s13  ;;  %520 = vrot.lane.b32.xlu2 %v1369_v0, %s1237_s19 }
  0x8e   : > { %379 = vrot.lane.b32.xlu0 %v1371_v1, %s1236_s13 }
  0x8f   : > { %v471_v7 = vpop.permute.xlu2 %470 }
  0x90   : > { %v476_v31 = vsel %vm474_vm1, %v465_v6, %v471_v7  ;;  %v479_v32 = vsel %vm474_vm1, %v471_v7, %v465_v6 }
  0x91   : > { %v485_v38 = vmul.f32 %v1516_v29, %v479_v32  ;;  %v486_v39 = vmul.f32 %v1519_v30, %v476_v31  ;;  %v1597_v31 = vperm.slane %v1478_v14, 0  ;;  %v1600_v32 = vperm.slane %v1483_v15, 0 }
  0x95   : > { %518 = vrot.lane.b32.xlu1 %v1377_v2, %s1237_s19  ;;  %524 = vrot.lane.b32.xlu2 %v1385_v5, %s1237_s19 }
  0x96   : > { %526 = vrot.lane.b32.xlu0 %v1381_v3, %s1237_s19 }
  0x97   : > { %v1465_v8 = vpop.permute.xlu2 %439 }
  0x9d   : > { %522 = vrot.lane.b32.xlu1 %v1383_v4, %s1237_s19  ;;  %493 = vrot.lane.b32.xlu2 %v1369_v0, %s1231_s25 }
  0x9e   : > { %516 = vrot.lane.b32.xlu0 %v1371_v1, %s1237_s19 }
  0x9f   : > { %v467_v9 = vpop.permute.xlu1 %466  ;;  %v444_v12 = vpop.permute.xlu2 %443 }
  0xa0   : > { %v490_v10 = vpop.permute.xlu0 %489 }
  0xa5   : > { %491 = vrot.lane.b32.xlu1 %v1377_v2, %s1231_s25  ;;  %497 = vrot.lane.b32.xlu2 %v1385_v5, %s1231_s25 }
  0xa6   : > { %499 = vrot.lane.b32.xlu0 %v1381_v3, %s1231_s25 }
  0xa7   : > { %v473_v18 = vpop.permute.xlu1 %472  ;;  %v1502_v22 = vpop.permute.xlu2 %574 }
  0xa8   : > { %v496_v19 = vpop.permute.xlu0 %495  ;;  %v477_v25 = vsel %vm474_vm1, %v467_v9, %v473_v18  ;;  %v480_v26 = vsel %vm474_vm1, %v473_v18, %v467_v9 }
  0xa9   : > { %v502_v20 = vsel %vm501_vm0, %v490_v10, %v496_v19  ;;  %v505_v21 = vsel %vm501_vm0, %v496_v19, %v490_v10  ;;  %v487_v34 = vmul.f32 %v1516_v29, %v480_v26  ;;  %v488_v35 = vmul.f32 %v1519_v30, %v477_v25 }
  0xaa   : > { %v510_v23 = vmul.f32 %v1491_v16, %v502_v20  ;;  %v511_v24 = vmul.f32 %v1494_v17, %v505_v21 }
  0xac   : > { %611 = vmatpush.msra.mxu0 %v510_v23  ;;  %651 = vmatpush.msra.mxu2 %v511_v24 }
  0xae   : > { %612 = vmatpush.msra.mxu0 %v1369_v0  ;;  %652 = vmatpush.msra.mxu2 %v1381_v3 }
  0xaf   : > { %v469_v27 = vpop.permute.xlu1 %468  ;;  %v419_v33 = vpop.permute.xlu2 %418 }
  0xb0   : > { %613 = vmatpush.msra.mxu0 %v1377_v2  ;;  %653 = vmatpush.msra.mxu2 %v1385_v5  ;;  %v463_v28 = vpop.permute.xlu0 %462 }
  0xb1   : > { %v475_v36 = vsel %vm474_vm1, %v463_v28, %v469_v27  ;;  %v478_v37 = vsel %vm474_vm1, %v469_v27, %v463_v28 }
  0xb2   : > { %614 = vmatpush.msra.mxu0 %v1371_v1  ;;  %654 = vmatpush.msra.mxu2 %v1383_v4  ;;  %v483_v40 = vmul.f32 %v1516_v29, %v478_v37  ;;  %v484_v41 = vmul.f32 %v1519_v30, %v475_v36 }
  0xb4   : > { %615 = vmatpush.msra.mxu0 %v487_v34  ;;  %655 = vmatpush.msra.mxu2 %v488_v35 }
  0xb6   : > { %616 = vmatpush.msra.mxu0 %v485_v38  ;;  %656 = vmatpush.msra.mxu2 %v486_v39 }
  0xb7   : > { %v438_v44 = vpop.permute.xlu1 %437  ;;  %v411_v54 = vpop.permute.xlu2 %410 }
  0xb8   : > { %617 = vmatpush.msra.mxu0 %v483_v40  ;;  %657 = vmatpush.msra.mxu2 %v484_v41  ;;  %v446_v45 = vpop.permute.xlu0 %445  ;;  %v449_v48 = vsel %vm447_vm2, %v438_v44, %v444_v12  ;;  %v452_v49 = vsel %vm447_vm2, %v444_v12, %v438_v44  ;;  %v378_v40 = vld [vmem:[%s1882_s4] sm:$0x77] }
  0xb9   : > { %v450_v46 = vsel %vm447_vm2, %v1465_v8, %v446_v45  ;;  %v453_v47 = vsel %vm447_vm2, %v446_v45, %v1465_v8  ;;  %v458_v52 = vmul.f32 %v1539_v42, %v452_v49  ;;  %v459_v53 = vmul.f32 %v1542_v43, %v449_v48  ;;  %604 = vst [vmem:[#allocation1] ss:$2 sm:$0xff] %v378_v40 }
  0xba   : > { %v460_v50 = vmul.f32 %v1539_v42, %v453_v47  ;;  %v461_v51 = vmul.f32 %v1542_v43, %v450_v46 }
  0xbc   : > { %618 = vmatpush.msra.mxu0 %v460_v50  ;;  %658 = vmatpush.msra.mxu2 %v461_v51 }
  0xbe   : > { %619 = vmatpush.msra.mxu0 %v458_v52  ;;  %659 = vmatpush.msra.mxu2 %v459_v53  ;;  %v1623_v52 = vperm.slane %v1478_v14, 7  ;;  %v1626_v53 = vperm.slane %v1483_v15, 7 }
  0xbf   : > { %v442_v55 = vpop.permute.xlu1 %441  ;;  %v1564_v61 = vpop.permute.xlu2 %576 }
  0xc0   : > { %v436_v56 = vpop.permute.xlu0 %435 }
  0xc1   : > { %v448_v57 = vsel %vm447_vm2, %v436_v56, %v442_v55  ;;  %v451_v58 = vsel %vm447_vm2, %v442_v55, %v436_v56 }
  0xc2   : > { %v456_v59 = vmul.f32 %v1539_v42, %v451_v58  ;;  %v457_v60 = vmul.f32 %v1542_v43, %v448_v57 }
  0xc4   : > { %620 = vmatpush.msra.mxu0 %v456_v59  ;;  %660 = vmatpush.msra.mxu2 %v457_v60  ;;  %v1238_v59 = vmov 0  }
  0xc5   : > { %1107 = vset.pattern.permute.xlu0 %v1238_v59  ;;  %1108 = vset.pattern.permute.xlu1 %v1238_v59 }
  0xc6   : > { %1109 = vset.pattern.permute.xlu2 %v1238_v59 }
  0xc7   : > { %v413_v0 = vpop.permute.xlu1 %412  ;;  %v1579_v6 = vpop.permute.xlu2 %547 }
  0xc8   : > { %v581_v1 = vpop.permute.xlu0 %580  ;;  %v423_v2 = vsel %vm420_vm3, %v413_v0, %v419_v33  ;;  %v426_v3 = vsel %vm420_vm3, %v419_v33, %v413_v0 }
  0xc9   : > { %v433_v4 = vmul.f32 %v1568_v62, %v426_v3  ;;  %v434_v5 = vmul.f32 %v1571_v63, %v423_v2  ;;  %v585_v55 = vsel %vm582_vm5, %v1502_v22, %v581_v1  ;;  %v588_v56 = vsel %vm582_vm5, %v581_v1, %v1502_v22 }
  0xcb   : > { %621 = vmatpush.msra.mxu0 %v433_v4  ;;  %661 = vmatpush.msra.mxu2 %v434_v5  ;;  %v595_v5 = vmul.f32 %v1623_v52, %v585_v55 }
  0xcf   : > { %v579_v7 = vpop.permute.xlu1 %578  ;;  %v390_v18 = vpop.permute.xlu2 %389 }
  0xd0   : > { %v573_v8 = vpop.permute.xlu0 %572 }
  0xd1   : > { %v584_v2 = vsel %vm582_vm5, %v573_v8, %v579_v7  ;;  %v587_v3 = vsel %vm582_vm5, %v579_v7, %v573_v8 }
  0xd2   : > { %v593_v8 = vmul.f32 %v1623_v52, %v584_v2 }
  0xd7   : > { %v1581_v9 = vpop.permute.xlu1 %570  ;;  %v382_v28 = vpop.permute.xlu2 %381 }
  0xd8   : > { %v417_v10 = vpop.permute.xlu0 %416  ;;  %v586_v7 = vsel %vm582_vm5, %v1564_v61, %v1581_v9 }
  0xd9   : > { %v422_v11 = vsel %vm420_vm3, %v411_v54, %v417_v10  ;;  %v425_v12 = vsel %vm420_vm3, %v417_v10, %v411_v54  ;;  %v597_v54 = vld [vmem:[%s1883_s5] sm:$0x7]  ;;  %v596_v10 = vmul.f32 %v1626_v53, %v588_v56 }
  0xda   : > { %v431_v19 = vmul.f32 %v1568_v62, %v425_v12  ;;  %v432_v20 = vmul.f32 %v1571_v63, %v422_v11  ;;  %600 = vperm.xlu0 %1107, %v597_v54   ;;  %v605_v11 = vld.sshfl [vmem:[#allocation1] sm:$0xff pattern:$0x75316420]  ;;  %v583_v12 = vsel %vm582_vm5, %v1581_v9, %v1564_v61 }
  0xdb   : > { %v591_v9 = vmul.f32 %v1623_v52, %v583_v12 }
  0xdc   : > { %622 = vmatpush.msra.mxu0 %v431_v19  ;;  %662 = vmatpush.msra.mxu2 %v432_v20  ;;  %v1661_v19 = vperm.slane %v1478_v14, 6  ;;  %v1664_v20 = vperm.slane %v1483_v15, 6 }
  0xdf   : > { %v415_v21 = vpop.permute.xlu1 %414  ;;  %v1608_v39 = vpop.permute.xlu2 %549 }
  0xe0   : > { %v409_v23 = vpop.permute.xlu0 %408 }
  0xe1   : > { %v421_v24 = vsel %vm420_vm3, %v409_v23, %v415_v21  ;;  %v424_v25 = vsel %vm420_vm3, %v415_v21, %v409_v23  ;;  %v592_v23 = vmul.f32 %v1626_v53, %v586_v7 }
  0xe2   : > { %v429_v26 = vmul.f32 %v1568_v62, %v424_v25  ;;  %v430_v27 = vmul.f32 %v1571_v63, %v421_v24 }
  0xe4   : > { %623 = vmatpush.msra.mxu0 %v429_v26  ;;  %663 = vmatpush.msra.mxu2 %v430_v27 }
  0xe7   : > { %v384_v33 = vpop.permute.xlu1 %383  ;;  %v1613_v45 = vpop.permute.xlu2 %520 }
  0xe8   : > { %v554_v34 = vpop.permute.xlu0 %553  ;;  %v396_v35 = vsel %vm393_vm4, %v384_v33, %v390_v18  ;;  %v399_v36 = vsel %vm393_vm4, %v390_v18, %v384_v33  ;;  %v594_v18 = vmul.f32 %v1626_v53, %v587_v3 }
  0xe9   : > { %v406_v37 = vmul.f32 %v1597_v31, %v399_v36  ;;  %v407_v38 = vmul.f32 %v1600_v32, %v396_v35  ;;  %v558_v21 = vsel %vm555_vm6, %v1579_v6, %v554_v34  ;;  %v561_v61 = vsel %vm555_vm6, %v554_v34, %v1579_v6 }
  0xea   : > { %v568_v6 = vmul.f32 %v1661_v19, %v558_v21 }
  0xeb   : > { %624 = vmatpush.msra.mxu0 %v406_v37  ;;  %664 = vmatpush.msra.mxu2 %v407_v38  ;;  %v1690_v37 = vperm.slane %v1478_v14, 5  ;;  %v1693_v38 = vperm.slane %v1483_v15, 5 }
  0xef   : > { %v552_v41 = vpop.permute.xlu1 %551  ;;  %v525_v4 = vpop.permute.xlu2 %524 }
  0xf0   : > { %v546_v44 = vpop.permute.xlu0 %545 }
  0xf1   : > { %v557_v24 = vsel %vm555_vm6, %v546_v44, %v552_v41  ;;  %v560_v25 = vsel %vm555_vm6, %v552_v41, %v546_v44 }
  0xf2   : > { %v566_v35 = vmul.f32 %v1661_v19, %v557_v24  ;;  %v567_v36 = vmul.f32 %v1664_v20, %v560_v25 }
  0xf7   : > { %v544_v46 = vpop.permute.xlu1 %543  ;;  %v494_v41 = vpop.permute.xlu2 %493 }
  0xf8   : > { %v388_v47 = vpop.permute.xlu0 %387  ;;  %v556_v33 = vsel %vm555_vm6, %v544_v46, %v1608_v39  ;;  %v559_v34 = vsel %vm555_vm6, %v1608_v39, %v544_v46 }
  0xf9   : > { %v395_v48 = vsel %vm393_vm4, %v382_v28, %v388_v47  ;;  %v398_v49 = vsel %vm393_vm4, %v388_v47, %v382_v28  ;;  %v569_v28 = vmul.f32 %v1664_v20, %v561_v61  ;;  %v564_v14 = vmul.f32 %v1661_v19, %v556_v33 }
  0xfa   : > { %v404_v50 = vmul.f32 %v1597_v31, %v398_v49  ;;  %v405_v51 = vmul.f32 %v1600_v32, %v395_v48  ;;  %v565_v46 = vmul.f32 %v1664_v20, %v559_v34  ;;  %v367_v34 = vld [vmem:[%s360_s11 + $0x8] sm:$0x1f] }
  0xfc   : > { %625 = vmatpush.msra.mxu0 %v404_v50  ;;  %665 = vmatpush.msra.mxu2 %v405_v51 }
  0xff   : > { %v386_v57 = vpop.permute.xlu1 %385 }
 0x100   : > { %v380_v58 = vpop.permute.xlu0 %379 }
 0x101   : > { %v394_v60 = vsel %vm393_vm4, %v380_v58, %v386_v57  ;;  %v397_v0 = vsel %vm393_vm4, %v386_v57, %v380_v58  ;;  %v498_v58 = vpop.permute.xlu2 %497 }
 0x102   : > { %v402_v22 = vmul.f32 %v1597_v31, %v397_v0  ;;  %v403_v1 = vmul.f32 %v1600_v32, %v394_v60 }
 0x104   : > { %626 = vmatpush.msra.mxu0 %v402_v22  ;;  %666 = vmatpush.msra.mxu2 %v403_v1 }
 0x105   : > { %627 = vmatmul.f32.vlgmr.msra.gmra.mxu0 %v605_v11  ;;  %667 = vmatmul.f32.vlgmr.msra.gmra.mxu2 %v605_v11  ;;  %v606_v11 = vld.sshfl [vmem:[#allocation1 + $0x8] sm:$0xff pattern:$0x75316420] }
 0x106   : > { %636 = vmatpush.msrb.mxu0 %v595_v5  ;;  %676 = vmatpush.msrb.mxu2 %v596_v10 }
 0x107   : > { %v519_v26 = vpop.permute.xlu1 %518 }
 0x108   : > { %637 = vmatpush.msrb.mxu0 %v593_v8  ;;  %677 = vmatpush.msrb.mxu2 %v594_v18  ;;  %v527_v27 = vpop.permute.xlu0 %526  ;;  %v530_v44 = vsel %vm528_vm7, %v519_v26, %v525_v4  ;;  %v533_v15 = vsel %vm528_vm7, %v525_v4, %v519_v26 }
 0x109   : > { %v531_v40 = vsel %vm528_vm7, %v1613_v45, %v527_v27  ;;  %v534_v39 = vsel %vm528_vm7, %v527_v27, %v1613_v45  ;;  %v539_v50 = vmul.f32 %v1690_v37, %v530_v44  ;;  %v540_v55 = vmul.f32 %v1693_v38, %v533_v15 }
 0x10a   : > { %638 = vmatpush.msrb.mxu0 %v591_v9  ;;  %678 = vmatpush.msrb.mxu2 %v592_v23  ;;  %v541_v47 = vmul.f32 %v1690_v37, %v531_v40  ;;  %v542_v48 = vmul.f32 %v1693_v38, %v534_v39  ;;  %v366_v23 = vld [vmem:[%s360_s11] sm:$0x1f]  ;;  %v772_v40 = vld [vmem:[%s1885_s7 + $0x10] sm:$0xff] }
 0x10c   : > { %639 = vmatpush.msrb.mxu0 %v568_v6  ;;  %679 = vmatpush.msrb.mxu2 %v569_v28 }
 0x10e   : > { %640 = vmatpush.msrb.mxu0 %v566_v35  ;;  %680 = vmatpush.msrb.mxu2 %v567_v36  ;;  %v770_v36 = vld [vmem:[%s1885_s7] sm:$0xff] }
 0x10f   : > { %v523_v45 = vpop.permute.xlu1 %522 }
 0x110   : > { %641 = vmatpush.msrb.mxu0 %v564_v14  ;;  %681 = vmatpush.msrb.mxu2 %v565_v46  ;;  %v517_v49 = vpop.permute.xlu0 %516 }
 0x111   : > { %v529_v51 = vsel %vm528_vm7, %v517_v49, %v523_v45  ;;  %v532_v54 = vsel %vm528_vm7, %v523_v45, %v517_v49 }
 0x112   : > { %642 = vmatpush.msrb.mxu0 %v541_v47  ;;  %682 = vmatpush.msrb.mxu2 %v542_v48  ;;  %v537_v56 = vmul.f32 %v1690_v37, %v529_v51  ;;  %v538_v57 = vmul.f32 %v1693_v38, %v532_v54 }
 0x114   : > { %643 = vmatpush.msrb.mxu0 %v539_v50  ;;  %683 = vmatpush.msrb.mxu2 %v540_v55 }
 0x116   : > { %644 = vmatpush.msrb.mxu0 %v537_v56  ;;  %684 = vmatpush.msrb.mxu2 %v538_v57 }
 0x117   : > { %v492_v60 = vpop.permute.xlu1 %491 }
 0x118   : > { %v500_v59 = vpop.permute.xlu0 %499  ;;  %v503_v3 = vsel %vm501_vm0, %v492_v60, %v498_v58  ;;  %v506_v22 = vsel %vm501_vm0, %v498_v58, %v492_v60 }
 0x119   : > { %v504_v0 = vsel %vm501_vm0, %v494_v41, %v500_v59  ;;  %v507_v2 = vsel %vm501_vm0, %v500_v59, %v494_v41  ;;  %v512_v5 = vmul.f32 %v1491_v16, %v503_v3  ;;  %v513_v10 = vmul.f32 %v1494_v17, %v506_v22 }
 0x11a   : > { %v514_v1 = vmul.f32 %v1491_v16, %v504_v0  ;;  %v515_v4 = vmul.f32 %v1494_v17, %v507_v2 }
 0x11c   : > { %645 = vmatpush.msrb.mxu0 %v514_v1  ;;  %685 = vmatpush.msrb.mxu2 %v515_v4 }
 0x11e   : > { %646 = vmatpush.msrb.mxu0 %v512_v5  ;;  %686 = vmatpush.msrb.mxu2 %v513_v10 }
 0x11f   : > { %1028 = vmatmul.msk.f32.vlgmr.msrb.gmra.mxu0 %vm608_vm8, %v606_v11  ;;  %1029 = vmatmul.msk.f32.vlgmr.msrb.gmra.mxu2 %vm608_vm8, %v606_v11 }
 0x14c   : > { %v601_v7 = vpop.permute.xlu0 %600 }
 0x182   : > { %v628_v12 = vpop.f32.mrf.mxu0 }
 0x183   : > { %v629_v18 = vadd.f32 %v628_v12, %v601_v7 }
 0x188   : > { %v668_v8 = vpop.f32.mrf.mxu2 }
 0x189   : > { %v669_v27 = vadd.f32 %v668_v8, %v601_v7 }
 0x19c   : > { %v648_v21 = vpop.f32.mrf.mxu0 }
 0x19d   : > { %v649_v61 = vadd.f32 %v648_v21, %v629_v18  ;;  %v771_v21 = vld [vmem:[%s1885_s7 + $0x8] sm:$0xff] }
 0x19f   : > { %v691_v9 = vmax.f32 %v649_v61, 0.0  ;;  %v773_v61 = vld [vmem:[%s1885_s7 + $0x18] sm:$0xff] }
 0x1a1   : > { %v699_v24 = vrot.slane %v691_v9, 3 }
 0x1a2   : > { %v688_v26 = vpop.f32.mrf.mxu2 }
 0x1a3   : > { %v1739_v25 = vsel %vm703_vm9, %v366_v23, %v699_v24  ;;  %v689_v6 = vadd.f32 %v688_v26, %v669_v27  ;;  %v693_v24 = vld [vmem:[%s1884_s6] sm:$0xff] }
 0x1a4   : > { %738 = vrot.lane.b32.xlu2 %v1739_v25, %s1231_s25  ;;  %746 = vrot.lane.b32.xlu0 %v1739_v25, %s1237_s19 }
 0x1a5   : > { %762 = vrot.lane.b32.xlu1 %v1739_v25, %s1233_s26  ;;  %v692_v28 = vmax.f32 %v689_v6, 0.0 }
 0x1a7   : > { %v700_v33 = vrot.slane %v692_v28, 3 }
 0x1a9   : > { %v705_v35 = vsel %vm703_vm9, %v367_v34, %v700_v33 }
 0x1ac   : > { %714 = vrot.lane.b32.xlu2 %v1739_v25, %s1234_s10  ;;  %722 = vrot.lane.b32.xlu0 %v1739_v25, %s1232_s15 }
 0x1ad   : > { %754 = vrot.lane.b32.xlu1 %v1739_v25, %s1235_s12 }
 0x1b4   : > { %764 = vrot.lane.b32.xlu2 %v705_v35, %s1233_s26  ;;  %740 = vrot.lane.b32.xlu0 %v705_v35, %s1231_s25 }
 0x1b5   : > { %730 = vrot.lane.b32.xlu1 %v1739_v25, %s1230_s24 }
 0x1bc   : > { %756 = vrot.lane.b32.xlu2 %v705_v35, %s1235_s12  ;;  %716 = vrot.lane.b32.xlu0 %v705_v35, %s1234_s10  ;;  %s365_s12 = scalar_lea.vmem %s1880_s2, %s1043_s18  ;;  %s1045_s18 = sshll.u32 %s1306_s9, 5 }
 0x1bd   : > { %748 = vrot.lane.b32.xlu1 %v705_v35, %s1237_s19  ;;  %s917_s29 = scalar_lea.hbm %s1886_s8, %s1045_s18  ;;  %s906_s9 = scalar_lea.sflag [#allocation4], %s1361_s23 }
 0x1be   : > { %s920_s14 = sshll.u32 %s917_s29, 4  ;;  %s921_s14 = int_to_ptr.hbm [resolvable:$true] %s920_s14 }
 0x1bf   : > { %s1174_s21 = sshra.s32 %s921_s14, 4  ;;  %s1175_s21 = int_to_ptr.hbm [resolvable:$true] %s1174_s21 }
 0x1c0   : > { %s1176_s26 = scalar_lea.hbm %s1175_s21, 32  ;;  %p1181_p4 = scmp.lt.s32.totalorder %s1175_s21, %s1886_s8 }
 0x1c1   : > { %p1177_p13 = scmp.ne.s32.totalorder %s1175_s21, %s1176_s26 }
 0x1c3   : > { %p1178_p2 = pnand %p1177_p13, %p1331_p11 }
 0x1c4   : > { %732 = vrot.lane.b32.xlu2 %v705_v35, %s1230_s24  ;;  %776 = vperm.xlu0 %1107, %v770_v36  }
 0x1c5   : > { %724 = vrot.lane.b32.xlu1 %v705_v35, %s1232_s15  ;;  %p1179_p3 = pneg %p1178_p2  ;;  %s1180_s15 = scalar_lea.hbm %s1886_s8, 64 }
 0x1c6   : > { %p1182_p5 = scmp.lt.s32.totalorder %s1180_s15, %s1176_s26 }
 0x1c8   : > { %p1183_p7 = por %p1182_p5, %p1181_p4 }
 0x1ca   : > { %p1184_p8 = pnand %p1183_p7, %p1179_p3 }
 0x1cc   : > { %708 = vrot.lane.b32.xlu2 %v705_v35, %s1236_s13  ;;  %786 = vperm.xlu0 %1107, %v772_v40  }
 0x1cd   : > { %706 = vrot.lane.b32.xlu1 %v1739_v25, %s1236_s13  ;;  %s1023_s13 = sshll.u32 %s1361_s23, 5 }
 0x1ce   : > { %s355_s22 = scalar_lea.vmem [#allocation5], %s1023_s13 }
 0x1cf   : > { %s918_s11 = sshll.u32 %s355_s22, 4  ;;  %s919_s11 = int_to_ptr.vmem [resolvable:$true] %s918_s11 }
 0x1d4   : > { %791 = vperm.xlu2 %1109, %v773_v61  }
 0x1d5   : > { %781 = vperm.xlu1 %1108, %v771_v21  }
 0x1fe   : > { %v739_v39 = vpop.permute.xlu2 %738 }
 0x206   : > { %v715_v41 = vpop.permute.xlu2 %714 }
 0x20e   : > { %v765_v44 = vpop.permute.xlu2 %764 }
 0x216   : > { %v747_v14 = vpop.permute.xlu0 %746  ;;  %v757_v49 = vpop.permute.xlu2 %756 }
 0x217   : > { %v763_v46 = vpop.permute.xlu1 %762 }
 0x218   : > { %v766_v15 = vsel %vm582_vm5, %v763_v46, %v765_v44  ;;  %v767_v47 = vsel %vm582_vm5, %v765_v44, %v763_v46 }
 0x219   : > { %v768_v48 = vmul.f32 %v766_v15, %v1623_v52  ;;  %v769_v45 = vmul.f32 %v767_v47, %v1626_v53 }
 0x21b   : > { %814 = vmatpush.msra.mxu1 %v768_v48  ;;  %843 = vmatpush.msra.mxu3 %v769_v45 }
 0x21e   : > { %v723_v55 = vpop.permute.xlu0 %722  ;;  %v733_v3 = vpop.permute.xlu2 %732 }
 0x21f   : > { %v755_v50 = vpop.permute.xlu1 %754 }
 0x220   : > { %v758_v51 = vsel %vm555_vm6, %v755_v50, %v757_v49  ;;  %v759_v54 = vsel %vm555_vm6, %v757_v49, %v755_v50 }
 0x221   : > { %v760_v56 = vmul.f32 %v758_v51, %v1661_v19  ;;  %v761_v57 = vmul.f32 %v759_v54, %v1664_v20 }
 0x223   : > { %815 = vmatpush.msra.mxu1 %v760_v56  ;;  %844 = vmatpush.msra.mxu3 %v761_v57 }
 0x226   : > { %v741_v58 = vpop.permute.xlu0 %740 }
 0x227   : > { %v731_v52 = vpop.permute.xlu1 %730  ;;  %v742_v59 = vsel %vm501_vm0, %v739_v39, %v741_v58  ;;  %v743_v60 = vsel %vm501_vm0, %v741_v58, %v739_v39 }
 0x228   : > { %v744_v22 = vmul.f32 %v742_v59, %v1491_v16  ;;  %v745_v1 = vmul.f32 %v743_v60, %v1494_v17  ;;  %v734_v4 = vsel %vm474_vm1, %v731_v52, %v733_v3  ;;  %v735_v5 = vsel %vm474_vm1, %v733_v3, %v731_v52 }
 0x229   : > { %v737_v11 = vmul.f32 %v734_v4, %v1519_v30 }
 0x22e   : > { %v717_v10 = vpop.permute.xlu0 %716 }
 0x22f   : > { %v749_v53 = vpop.permute.xlu1 %748  ;;  %v718_v16 = vsel %vm420_vm3, %v715_v41, %v717_v10  ;;  %v719_v17 = vsel %vm420_vm3, %v717_v10, %v715_v41 }
 0x230   : > { %v750_v0 = vsel %vm528_vm7, %v747_v14, %v749_v53  ;;  %v751_v2 = vsel %vm528_vm7, %v749_v53, %v747_v14  ;;  %v720_v30 = vmul.f32 %v719_v17, %v1568_v62  ;;  %v721_v18 = vmul.f32 %v718_v16, %v1571_v63 }
 0x231   : > { %v752_v19 = vmul.f32 %v750_v0, %v1690_v37  ;;  %v753_v20 = vmul.f32 %v751_v2, %v1693_v38  ;;  %v736_v38 = vmul.f32 %v735_v5, %v1516_v29  ;;  %v374_v2 = vld [vmem:[%s365_s12] sm:$0xff] }
 0x233   : > { %816 = vmatpush.msra.mxu1 %v752_v19  ;;  %845 = vmatpush.msra.mxu3 %v753_v20 }
 0x235   : > { %817 = vmatpush.msra.mxu1 %v744_v22  ;;  %846 = vmatpush.msra.mxu3 %v745_v1 }
 0x236   : > { %v777_v33 = vpop.permute.xlu0 %776 }
 0x237   : > { %818 = vmatpush.msra.mxu1 %v1739_v25  ;;  %847 = vmatpush.msra.mxu3 %v705_v35  ;;  %v725_v37 = vpop.permute.xlu1 %724  ;;  %v694_v25 = vld [vmem:[%s1884_s6 + $0x8] sm:$0xff] }
 0x238   : > { %v726_v12 = vsel %vm447_vm2, %v723_v55, %v725_v37  ;;  %v727_v7 = vsel %vm447_vm2, %v725_v37, %v723_v55 }
 0x239   : > { %819 = vmatpush.msra.mxu1 %v736_v38  ;;  %848 = vmatpush.msra.mxu3 %v737_v11  ;;  %v728_v8 = vmul.f32 %v727_v7, %v1539_v42  ;;  %v729_v29 = vmul.f32 %v726_v12, %v1542_v43  ;;  %v709_v42 = vpop.permute.xlu2 %708  ;;  %v375_v38 = vld [vmem:[%s365_s12 + $0x8] sm:$0xff] }
 0x23b   : > { %820 = vmatpush.msra.mxu1 %v728_v8  ;;  %849 = vmatpush.msra.mxu3 %v729_v29 }
 0x23d   : > { %821 = vmatpush.msra.mxu1 %v720_v30  ;;  %850 = vmatpush.msra.mxu3 %v721_v18 }
 0x23e   : > { %v787_v46 = vpop.permute.xlu0 %786 }
 0x23f   : > { %v707_v43 = vpop.permute.xlu1 %706 }
 0x240   : > { %v710_v9 = vsel %vm393_vm4, %v707_v43, %v709_v42  ;;  %v711_v62 = vsel %vm393_vm4, %v709_v42, %v707_v43 }
 0x241   : > { %v712_v63 = vmul.f32 %v711_v62, %v1597_v31  ;;  %v713_v23 = vmul.f32 %v710_v9, %v1600_v32  ;;  %v696_v31 = vld [vmem:[%s1884_s6 + $0x18] sm:$0xff]  ;;  %v792_v48 = vpop.permute.xlu2 %791 }
 0x243   : > { %822 = vmatpush.msra.mxu1 %v712_v63  ;;  %851 = vmatpush.msra.mxu3 %v713_v23 }
 0x244   : > { %1030 = vmatmul.msk.f32.vlgmr.msra.gmra.mxu1 %vm794_vm10, %v693_v24  ;;  %1034 = vmatmul.msk.f32.vlgmr.msra.gmra.mxu3 %vm794_vm10, %v693_v24 }
 0x247   : > { %v782_v27 = vpop.permute.xlu1 %781 }
 0x24c   : > { %1031 = vmatmul.msk.f32.gmra.mxu1 %vm794_vm10, %v694_v25  ;;  %1035 = vmatmul.msk.f32.gmra.mxu3 %vm794_vm10, %v694_v25 }
 0x254   : > { %1032 = vmatmul.msk.f32.gmra.mxu1 %vm794_vm10, %v695_v13  ;;  %1036 = vmatmul.msk.f32.gmra.mxu3 %vm794_vm10, %v695_v13 }
 0x25c   : > { %1033 = vmatmul.msk.f32.gmra.mxu1 %vm794_vm10, %v696_v31  ;;  %1037 = vmatmul.msk.f32.gmra.mxu3 %vm794_vm10, %v696_v31 }
 0x2c1   : > { %v824_v32 = vpop.f32.mrf.mxu1 }
 0x2c2   : > { %v825_v34 = vadd.f32 %v824_v32, %v777_v33 }
 0x2c4   : > { %v865_v39 = vmul.f32 0.5, %v825_v34 }
 0x2c7   : > { %v853_v26 = vpop.f32.mrf.mxu3 }
 0x2c8   : > { %v854_v44 = vadd.f32 %v853_v26, %v777_v33 }
 0x2c9   : > { %v827_v6 = vpop.f32.mrf.mxu1 }
 0x2ca   : > { %v828_v28 = vadd.f32 %v827_v6, %v782_v27  ;;  %v866_v15 = vmul.f32 0.5, %v854_v44 }
 0x2cc   : > { %v873_v36 = vmul.f32 0.5, %v828_v28 }
 0x2ce   : > { %1110 = vtanh.f32 %v873_v36 }
 0x2cf   : > { %v856_v35 = vpop.f32.mrf.mxu3  ;;  %1112 = vtanh.f32 %v865_v39 }
 0x2d0   : > { %v857_v40 = vadd.f32 %v856_v35, %v782_v27 }
 0x2d1   : > { %v830_v41 = vpop.f32.mrf.mxu1 }
 0x2d2   : > { %v874_v14 = vmul.f32 0.5, %v857_v40  ;;  %v831_v45 = vadd.f32 %v830_v41, %v787_v46 }
 0x2d4   : > { %1114 = vtanh.f32 %v874_v14  ;;  %v1111_v49 = vpop.eup %1110  ;;  %v881_v56 = vmul.f32 0.5, %v831_v45 }
 0x2d5   : > { %1116 = vtanh.f32 %v866_v15  ;;  %v1113_v54 = vpop.eup %1112  ;;  %v877_v55 = vadd.f32 1.0, %v1111_v49 }
 0x2d6   : > { %v869_v58 = vadd.f32 1.0, %v1113_v54 }
 0x2d7   : > { %v859_v47 = vpop.f32.mrf.mxu3  ;;  %v879_v60 = vmul.f32 0.5, %v877_v55 }
 0x2d8   : > { %v860_v57 = vadd.f32 %v859_v47, %v787_v46  ;;  %v871_v3 = vmul.f32 0.5, %v869_v58 }
 0x2d9   : > { %v833_v50 = vpop.f32.mrf.mxu1  ;;  %v891_v4 = vmul.f32 %v879_v60, %v374_v2 }
 0x2da   : > { %v834_v51 = vadd.f32 %v833_v50, %v792_v48  ;;  %v1115_v52 = vpop.eup %1114  ;;  %v882_v20 = vmul.f32 0.5, %v860_v57 }
 0x2db   : > { %v1117_v59 = vpop.eup %1116  ;;  %v878_v19 = vadd.f32 1.0, %v1115_v52 }
 0x2dc   : > { %1118 = vtanh.f32 %v834_v51  ;;  %v870_v1 = vadd.f32 1.0, %v1117_v59 }
 0x2dd   : > { %1120 = vtanh.f32 %v881_v56  ;;  %v880_v10 = vmul.f32 0.5, %v878_v19 }
 0x2de   : > { %v872_v16 = vmul.f32 0.5, %v870_v1 }
 0x2df   : > { %v862_v53 = vpop.f32.mrf.mxu3  ;;  %v892_v12 = vmul.f32 %v880_v10, %v375_v38 }
 0x2e0   : > { %v863_v0 = vadd.f32 %v862_v53, %v792_v48 }
 0x2e2   : > { %1122 = vtanh.f32 %v863_v0  ;;  %v1119_v22 = vpop.eup %1118 }
 0x2e3   : > { %v893_v5 = vmul.f32 %v1119_v22, %v871_v3  ;;  %1124 = vtanh.f32 %v882_v20  ;;  %v1121_v37 = vpop.eup %1120 }
 0x2e4   : > { %v885_v7 = vadd.f32 1.0, %v1121_v37 }
 0x2e5   : > { %v895_v11 = vadd.f32 %v893_v5, %v891_v4 }
 0x2e6   : > { %v887_v18 = vmul.f32 0.5, %v885_v7 }
 0x2e7   : > { %1126 = vtanh.f32 %v895_v11  ;;  %901 = vst [vmem:[%s355_s22] sm:$0xff] %v895_v11 }
 0x2e8   : > { %v1123_v17 = vpop.eup %1122 }
 0x2e9   : > { %v894_v8 = vmul.f32 %v1123_v17, %v872_v16  ;;  %v1125_v29 = vpop.eup %1124 }
 0x2ea   : > { %v886_v61 = vadd.f32 1.0, %v1125_v29 }
 0x2eb   : > { %v896_v30 = vadd.f32 %v894_v8, %v892_v12 }
 0x2ec   : > { %v888_v43 = vmul.f32 0.5, %v886_v61 }
 0x2ed   : > { %1128 = vtanh.f32 %v896_v30  ;;  %902 = vst [vmem:[%s355_s22 + $0x8] sm:$0xff] %v896_v30  ;;  %v1127_v21 = vpop.eup %1126 }
 0x2ee   : > { %v899_v42 = vmul.f32 %v1127_v21, %v887_v18 }
 0x2f0   : > { %903 = vst [vmem:[%s355_s22 + $0x10] sm:$0xff] %v899_v42 }
 0x2f3   : > { %v1129_v9 = vpop.eup %1128 }
 0x2f4   : > { %v900_v62 = vmul.f32 %v1129_v9, %v888_v43 }
 0x2f6   : > { %904 = vst [vmem:[%s355_s22 + $0x18] sm:$0xff] %v900_v62 }
 0x2f7   : > { %1187 = shalt.err (!%p1184_p8)
}
 0x2f8   : > { %s1239_s23 = smov 256  }
 0x2f9   : > { %1051 = dma.vmem_to_hbm [thread:$0]  (%p1331_p11), %s919_s11, 512, %s921_s14, %s906_s9, %s1239_s23, %s1239_s23, %s1234_s10  }
 0x2fa PF: > { %s935_s22 = sand.u32 1, %s1214_s27   ;;  %p1058_p10 = pnand %p1020_p9, %p1335_p12 }
 0x2fb   : > { %s936_s18 = scalar_lea.sflag [#allocation4], %s935_s22 }
 0x2fc   : > { %p1059_p0 = pneg %p1058_p10 }
 0x2fe   : > { %1209 = dma.done.wait (%p1059_p0), %s936_s18, 512  }
 0x2ff   : > { %1211 = vsyncadd (%p1059_p0), %s936_s18, 4294966784  ;;  %s1897_s30 = sld [smem:[#allocation9_spill]]  ;;  %s1900_s27 = smov %s1218_s28 }
 0x300   : > { %s1898_s19 = sld [smem:[#allocation8_spill]] }
 0x301   : > { %s1899_s29 = sld [smem:[#allocation10_spill]] }
 0x305   : > { %p21_p1 = scmp.ge.s32.totalorder %s1897_s30, 4  }
 0x306   : > { %s1901_s28 = smov %s1898_s19 }
 0x307   :  { %23 = sbr.rel (!%p21_p1) target bundleno = 5 (0x5), region = 103 }
 0x30c   :  { %942 = vsyncpa [#allocation3], 1 }
 0x30d   :  { %944 = vsyncpa [#allocation3 + $0x1], 1 }
 0x30e   :  { %945 = vsyncpa [#allocation4], 1 }
 0x30f   :  { %947 = vsyncpa [#allocation4 + $0x1], 1 }

</bundles_post_ra>
